<compile_context>
chip_gen: v7x
topology: tpu7x:2x2x1
jax: 0.10.0
libtpu: 0.0.40
codegen_flags: <defaults>
</compile_context>

<pallas_src>
import functools

import jax
import jax.numpy as jnp
from jax.experimental import pallas as pl
from jax.experimental.pallas import tpu as pltpu


# ---------------------------------------------------------------------------
# Utilities
# ---------------------------------------------------------------------------

_LANE = 128


def _round_up(x, m):
    return ((x + m - 1) // m) * m


def _vmem_limit_bytes():
    """~75% of physical VMEM per core; conservative fallback if query fails."""
    try:
        cap = int(pltpu.get_tpu_info().vmem_capacity_bytes)
        limit = (cap * 3) // 4
    except Exception:
        limit = 48 * 1024 * 1024
    return max(32 * 1024 * 1024, min(limit, 112 * 1024 * 1024))


def _choose_tiles(N):
    """Return (Np, tm, tk): padded node count, row tile, contraction tile.

    Both tiles divide Np exactly (no full-extent fallback); tm % 8 == 0 and
    tk % 128 == 0 so the (8, 128) BlockSpec constraint always holds.
    """
    if N <= 512:
        Np = _round_up(N, _LANE)
        return Np, Np, Np
    Np = _round_up(N, 512)
    tm = 512
    tk = 512
    for cand in (2048, 1024):
        if Np % cand == 0:
            tk = cand
            break
    return Np, tm, tk


def _pad_rows(a, n_rows):
    pad = n_rows - a.shape[0]
    if pad == 0:
        return a
    return jnp.pad(a, ((0, pad), (0, 0)))


def _pad_square(g, n):
    pad = n - g.shape[0]
    if pad == 0:
        return g
    return jnp.pad(g, ((0, pad), (0, pad)))


# ---------------------------------------------------------------------------
# Kernels
# ---------------------------------------------------------------------------

def hgnn_feature_kernel(x_ref, w_ref, b_ref, h_ref):
    """h = X_tile @ W + b   (runs exactly once, for the first layer)."""
    h = jnp.dot(x_ref[...], w_ref[...], preferred_element_type=jnp.float32)
    h = h + b_ref[...].astype(jnp.float32)
    h_ref[...] = h.astype(h_ref.dtype)


def _accumulate_gh(g_ref, h_ref, acc_ref, *, h_resident, tk):
    """acc += G[i, k_tile] @ h[k_tile]   with f32 accumulator scratch."""
    k = pl.program_id(1)

    @pl.when(k == 0)
    def _():
        acc_ref[...] = jnp.zeros_like(acc_ref)

    if h_resident:
        start = pl.multiple_of(k * tk, tk)
        h_blk = h_ref[pl.ds(start, tk), :]
    else:
        h_blk = h_ref[...]
    acc_ref[...] += jnp.dot(g_ref[...], h_blk,
                            preferred_element_type=jnp.float32)


def hgnn_propagate_last_kernel(g_ref, h_ref, o_ref, acc_ref, *,
                               h_resident, tk):
    """Last layer: o = relu(G @ h)."""
    _accumulate_gh(g_ref, h_ref, acc_ref, h_resident=h_resident, tk=tk)

    @pl.when(pl.program_id(1) == pl.num_programs(1) - 1)
    def _():
        o_ref[...] = jnp.maximum(acc_ref[...], 0.0).astype(o_ref.dtype)


def hgnn_propagate_fused_kernel(g_ref, h_ref, w_ref, b_ref, o_ref, acc_ref, *,
                                h_resident, tk):
    """Mid layers: o = relu(G @ h) @ W_next + b_next  (next transform fused)."""
    _accumulate_gh(g_ref, h_ref, acc_ref, h_resident=h_resident, tk=tk)

    @pl.when(pl.program_id(1) == pl.num_programs(1) - 1)
    def _():
        y = jnp.maximum(acc_ref[...], 0.0)
        h_next = jnp.dot(y.astype(w_ref.dtype), w_ref[...],
                         preferred_element_type=jnp.float32)
        h_next = h_next + b_ref[...].astype(jnp.float32)
        o_ref[...] = h_next.astype(o_ref.dtype)


# ---------------------------------------------------------------------------
# pallas_call wrappers
# ---------------------------------------------------------------------------

def _feature_transform(x, w, b, *, tm, vmem_limit):
    Np, Cin = x.shape
    Cout = w.shape[1]
    itemsize = jnp.dtype(x.dtype).itemsize
    return pl.pallas_call(
        hgnn_feature_kernel,
        out_shape=jax.ShapeDtypeStruct((Np, Cout), x.dtype),
        grid_spec=pltpu.PrefetchScalarGridSpec(
            num_scalar_prefetch=0,
            grid=(Np // tm,),
            in_specs=[
                pl.BlockSpec((tm, Cin), lambda i: (i, 0)),   # rows of X
                pl.BlockSpec((Cin, Cout), lambda i: (0, 0)),  # full W
                pl.BlockSpec((1, Cout), lambda i: (0, 0)),    # bias
            ],
            out_specs=pl.BlockSpec((tm, Cout), lambda i: (i, 0)),
        ),
        compiler_params=pltpu.CompilerParams(
            dimension_semantics=("parallel",),
            vmem_limit_bytes=vmem_limit),
        cost_estimate=pl.CostEstimate(
            flops=2 * Np * Cin * Cout,
            transcendentals=0,
            bytes_accessed=itemsize * (Np * Cin + Cin * Cout + Cout
                                       + Np * Cout)),
    )(x, w, b)


def _propagate(g, h, *, w_next=None, b_next=None, tm, tk, h_resident,
               vmem_limit):
    Np = g.shape[0]
    Cout = h.shape[1]
    itemsize = jnp.dtype(g.dtype).itemsize
    out_c = Cout if w_next is None else w_next.shape[1]
    grid = (Np // tm, Np // tk)

    if h_resident:
        # Whole h slab resident in VMEM (constant index_map -> DMA'd once);
        # sliced by k inside the kernel.
        h_spec = pl.BlockSpec((Np, Cout), lambda i, k: (0, 0))
        h_bytes = Np * Cout * itemsize
    else:
        h_spec = pl.BlockSpec((tk, Cout), lambda i, k: (k, 0))
        h_bytes = (Np // tm) * Np * Cout * itemsize   # re-fetched per row tile

    in_specs = [pl.BlockSpec((tm, tk), lambda i, k: (i, k)), h_spec]
    operands = [g, h]

    if w_next is None:
        kernel = functools.partial(hgnn_propagate_last_kernel,
                                   h_resident=h_resident, tk=tk)
        extra_flops = 0
    else:
        kernel = functools.partial(hgnn_propagate_fused_kernel,
                                   h_resident=h_resident, tk=tk)
        in_specs += [pl.BlockSpec((Cout, out_c), lambda i, k: (0, 0)),
                     pl.BlockSpec((1, out_c), lambda i, k: (0, 0))]
        operands += [w_next, b_next]
        extra_flops = 2 * Np * Cout * out_c

    cost = pl.CostEstimate(
        flops=2 * Np * Np * Cout + extra_flops,
        transcendentals=0,
        bytes_accessed=itemsize * Np * Np + h_bytes + itemsize * Np * out_c)

    return pl.pallas_call(
        kernel,
        out_shape=jax.ShapeDtypeStruct((Np, out_c), g.dtype),
        grid_spec=pltpu.PrefetchScalarGridSpec(
            num_scalar_prefetch=0,
            grid=grid,
            in_specs=in_specs,
            out_specs=pl.BlockSpec((tm, out_c), lambda i, k: (i, 0)),
            scratch_shapes=[pltpu.VMEM((tm, Cout), jnp.float32)],
        ),
        compiler_params=pltpu.CompilerParams(
            dimension_semantics=("parallel", "arbitrary"),
            vmem_limit_bytes=vmem_limit),
        cost_estimate=cost,
    )(*operands)


# ---------------------------------------------------------------------------
# Model
# ---------------------------------------------------------------------------

def init_hgnn_params(key, input_channels, hidden_channels, num_layers,
                     dtype=jnp.float32):
    """Deterministic synthetic init (HGNN_conv uses uniform(-stdv, stdv))."""
    params = []
    c_in = input_channels
    for _ in range(num_layers):
        c_out = hidden_channels
        key, kw, kb = jax.random.split(key, 3)
        stdv = 1.0 / jnp.sqrt(jnp.asarray(c_out, dtype))
        w = jax.random.uniform(kw, (c_in, c_out), dtype, -stdv, stdv)
        b = jax.random.uniform(kb, (1, c_out), dtype, -stdv, stdv)
        params.append((w, b))
        c_in = c_out
    return params


def hgnn_forward(x, g, params, dropout_p=0.5, training=False,
                 compute_dtype=jnp.bfloat16):
    """Forward pass of HGNN: num_layers x relu(G @ (x @ W + b)), then dropout.

    compute_dtype=jnp.bfloat16 (default) halves G's HBM traffic; accumulation
    stays f32. Pass compute_dtype=None for a pure-f32 path.
    """
    N = g.shape[0]
    out_dtype = x.dtype
    Np, tm, tk = _choose_tiles(N)
    vmem_limit = _vmem_limit_bytes()

    # Cast ONCE (hoisted out of the per-layer loop).
    if compute_dtype is not None:
        g = g.astype(compute_dtype)
        x = x.astype(compute_dtype)
        params = [(w.astype(compute_dtype), b.astype(compute_dtype))
                  for (w, b) in params]
    io_dtype = g.dtype
    itemsize = jnp.dtype(io_dtype).itemsize

    # Pad ONCE. Zero rows/cols of G contribute nothing, so padded h rows
    # (which hold the bias) never leak into real outputs.
    g = _pad_square(g, Np)
    x = _pad_rows(x, Np)

    hidden = params[0][0].shape[1]
    h_resident = 2 * Np * hidden * itemsize <= 16 * 1024 * 1024

    # First layer's feature transform (runs exactly once).
    w0, b0 = params[0]
    h = _feature_transform(x, w0, b0, tm=tm, vmem_limit=vmem_limit)

    num_layers = len(params)
    for layer in range(num_layers):
        if layer + 1 < num_layers:
            w_next, b_next = params[layer + 1]
            h = _propagate(g, h, w_next=w_next, b_next=b_next, tm=tm, tk=tk,
                           h_resident=h_resident, vmem_limit=vmem_limit)
        else:
            h = _propagate(g, h, tm=tm, tk=tk, h_resident=h_resident,
                           vmem_limit=vmem_limit)

    # F.dropout is identity in eval mode (training=False).
    # TODO(synk): training-mode dropout via pltpu.prng_seed / prng_random_bits.
    return h[:N].astype(out_dtype)


def hgnn_forward_ref(x, g, params):
    for w, b in params:
        x = jnp.maximum(g @ (x @ w + b), 0.0)
    return x


# ---------------------------------------------------------------------------
# Self-test
# ---------------------------------------------------------------------------

def _make_laplacian(key, n_nodes, n_edges):
    """Dense hypergraph Laplacian G = Dv^-1/2 H W De^-1 H^T Dv^-1/2."""
    H = (jax.random.uniform(key, (n_nodes, n_edges)) > 0.5).astype(jnp.float32)
    W_e = jnp.ones((n_edges,), jnp.float32)
    Dv = jnp.maximum(H @ W_e, 1.0)
    De = jnp.maximum(H.sum(axis=0), 1.0)
    inv_sqrt_dv = 1.0 / jnp.sqrt(Dv)
    return (inv_sqrt_dv[:, None] * H * (W_e / De)[None, :]) @ (
        H.T * inv_sqrt_dv[None, :])


if __name__ == "__main__":
    input_channels = 8
    hidden_channels = 32
    num_layers = 3
    dropout = 0.5

    key = jax.random.PRNGKey(0)
    kx, kg, kp = jax.random.split(key, 3)

    # --- small case (N=16, padded to 128) -----------------------------------
    N = 16
    x = jax.random.normal(kx, (N, input_channels), jnp.float32)
    g = _make_laplacian(kg, N, 6)
    params = init_hgnn_params(kp, input_channels, hidden_channels, num_layers)

    ref = hgnn_forward_ref(x, g, params)

    # f32 compute path — tight tolerance.
    out_f32 = hgnn_forward(x, g, params, dropout_p=dropout, training=False,
                           compute_dtype=None)
    out_f32 = jax.block_until_ready(out_f32)
    assert out_f32.shape == (N, hidden_channels)
    assert jnp.allclose(out_f32, ref, atol=1e-4, rtol=1e-4), \
        "f32 mismatch vs JAX ref"

    # Default bf16-G compute path (f32 accumulation) — looser tolerance.
    out_bf16 = hgnn_forward(x, g, params, dropout_p=dropout, training=False)
    out_bf16 = jax.block_until_ready(out_bf16)
    assert out_bf16.shape == (N, hidden_channels)
    assert jnp.allclose(out_bf16.astype(jnp.float32), ref,
                        atol=1e-1, rtol=1e-1), "bf16 mismatch vs JAX ref"

    # --- non-divisible N exercises the padding path --------------------------
    key2 = jax.random.PRNGKey(1)
    k2x, k2g, k2p = jax.random.split(key2, 3)
    N2 = 200
    x2 = jax.random.normal(k2x, (N2, input_channels), jnp.float32)
    g2 = _make_laplacian(k2g, N2, 24)
    params2 = init_hgnn_params(k2p, input_channels, hidden_channels, 2)
    out2 = hgnn_forward(x2, g2, params2, compute_dtype=None)
    out2 = jax.block_until_ready(out2)
    ref2 = hgnn_forward_ref(x2, g2, params2)
    assert out2.shape == (N2, hidden_channels)
    assert jnp.allclose(out2, ref2, atol=1e-4, rtol=1e-4), \
        "padded-N mismatch vs JAX ref"

    print("KERNEL_OK")
</pallas_src>

<mosaic_0001>
module attributes {stable_mosaic.version = 11 : i64} {
  func.func @hgnn_feature_kernel(%arg0: i32, %arg1: memref<128x8xf32, #tpu.memory_space<vmem>>, %arg2: memref<8x32xf32, #tpu.memory_space<vmem>>, %arg3: memref<1x32xf32, #tpu.memory_space<vmem>>, %arg4: memref<128x32xf32, #tpu.memory_space<vmem>>) attributes {dimension_semantics = [#tpu.dimension_semantics<parallel>], iteration_bounds = array<i64: 1>, scalar_prefetch = 0 : i64, scratch_operands = 0 : i64, tpu.core_type = #tpu.core_type<tc>, window_params = [{transform_indices = @transform_0, window_bounds = array<i64: 128, 8>}, {pipeline_mode = #tpu.pipeline_mode<synchronous>, transform_indices = @transform_1, window_bounds = array<i64: 8, 32>}, {pipeline_mode = #tpu.pipeline_mode<synchronous>, transform_indices = @transform_2, window_bounds = array<i64: 1, 32>}, {transform_indices = @transform_3, window_bounds = array<i64: 128, 32>}]} {
    %c0 = arith.constant 0 : index
    %c0_0 = arith.constant 0 : index
    %0 = vector.load %arg1[%c0, %c0_0] : memref<128x8xf32, #tpu.memory_space<vmem>>, vector<128x8xf32>
    %c0_1 = arith.constant 0 : index
    %c0_2 = arith.constant 0 : index
    %1 = vector.load %arg2[%c0_1, %c0_2] : memref<8x32xf32, #tpu.memory_space<vmem>>, vector<8x32xf32>
    %cst = arith.constant dense<0.000000e+00> : vector<128x32xf32>
    %2 = tpu.matmul %0, %1, %cst {dimension_numbers = #tpu.dot_dimension_numbers<[1], [0], [0], [1], [0, 0, 1, 1], [], []>} : vector<128x8xf32>, vector<8x32xf32>, vector<128x32xf32> -> vector<128x32xf32>
    %c0_3 = arith.constant 0 : index
    %c0_4 = arith.constant 0 : index
    %3 = vector.load %arg3[%c0_3, %c0_4] : memref<1x32xf32, #tpu.memory_space<vmem>>, vector<1x32xf32>
    %4 = vector.broadcast %3 : vector<1x32xf32> to vector<128x32xf32>
    %5 = arith.addf %2, %4 : vector<128x32xf32>
    %c0_5 = arith.constant 0 : index
    %c0_6 = arith.constant 0 : index
    %6 = vector.load %arg4[%c0_5, %c0_6] : memref<128x32xf32, #tpu.memory_space<vmem>>, vector<128x32xf32>
    tpu.vector_store %arg4[%c0_5, %c0_6], %5 {strides = array<i32>} : memref<128x32xf32, #tpu.memory_space<vmem>>, vector<128x32xf32>,
    return
  }
  func.func @transform_0(%arg0: i32) -> (i32, i32) {
    %c0_i32 = arith.constant 0 : i32
    %c0_i32_0 = arith.constant 0 : i32
    return %arg0, %c0_i32 : i32, i32
  }
  func.func @transform_1(%arg0: i32) -> (i32, i32) {
    %c0_i32 = arith.constant 0 : i32
    %c0_i32_0 = arith.constant 0 : i32
    %c0_i32_1 = arith.constant 0 : i32
    return %c0_i32, %c0_i32_0 : i32, i32
  }
  func.func @transform_2(%arg0: i32) -> (i32, i32) {
    %c0_i32 = arith.constant 0 : i32
    %c0_i32_0 = arith.constant 0 : i32
    %c0_i32_1 = arith.constant 0 : i32
    return %c0_i32, %c0_i32_0 : i32, i32
  }
  func.func @transform_3(%arg0: i32) -> (i32, i32) {
    %c0_i32 = arith.constant 0 : i32
    %c0_i32_0 = arith.constant 0 : i32
    return %arg0, %c0_i32 : i32, i32
  }
}

</mosaic_0001>

<bundles_post_ra>
// kernel: tpu_custom_call.1
= control target key start
LH: loop header
LB: loop body
LE: loop exit
PB: predicated region body
PF: predicated region fallthrough
CT: control target
= control target key end

     0   :  { %vm38_vm0 = vcmask 64512   ;;  %vm232_vm1 = vcmask 261120   ;;  %s469_s1 = inlined_call_operand.vmem [shape: f32[8,32], index: 1, kind: input, shape index: {}]   ;;  %s470_s0 = inlined_call_operand.vmem [shape: f32[128,8], index: 0, kind: input, shape index: {}]   ;;  %s471_s2 = inlined_call_operand.vmem [shape: f32[1,32], index: 2, kind: input, shape index: {}]   ;;  %s472_s3 = inlined_call_operand.vmem [shape: f32[128,32], index: 3, kind: output, shape index: {}]  }
   0x1   :  { %v30_v0 = vld [vmem:[%s469_s1] sm:$0xff]  ;;  %v15_v3 = vld [vmem:[%s470_s0 + $0x8] sm:$0xff]  ;;  %v16_v5 = vld [vmem:[%s470_s0 + $0x10] sm:$0xff] }
   0x2   :  { %v14_v1 = vld [vmem:[%s470_s0] sm:$0xff]  ;;  %287 = vmatprep.subr.mxu0 %v30_v0  ;;  %313 = vmatprep.subr.mxu1 %v30_v0  ;;  %v23_v4 = vld [vmem:[%s470_s0 + $0x48] sm:$0xff]  ;;  %v24_v6 = vld [vmem:[%s470_s0 + $0x50] sm:$0xff] }
   0x3   :  { %v22_v2 = vld [vmem:[%s470_s0 + $0x40] sm:$0xff]  ;;  %288 = vmatpush3.msra.mxu0 %v30_v0  ;;  %314 = vmatpush3.msra.mxu1 %v30_v0  ;;  %v17_v7 = vld [vmem:[%s470_s0 + $0x18] sm:$0xff]  ;;  %v19_v11 = vld [vmem:[%s470_s0 + $0x28] sm:$0xff] }
   0x4   :  { %289 = vmatprep.mubr.msk.f32.mxu0 %vm38_vm0, %v14_v1  ;;  %301 = vmatprep.mubr.msk.f32.mxu1 %vm38_vm0, %v22_v2  ;;  %v25_v8 = vld [vmem:[%s470_s0 + $0x58] sm:$0xff]  ;;  %v18_v9 = vld [vmem:[%s470_s0 + $0x20] sm:$0xff]  ;;  %v27_v12 = vld [vmem:[%s470_s0 + $0x68] sm:$0xff] }
   0x5   :  { %290 = vmatmul.mubr.msk.f32.vlgmr.msra.gmra.mrb[0].mxu0 %vm38_vm0, %v15_v3  ;;  %302 = vmatmul.mubr.msk.f32.vlgmr.msra.gmra.mrb[0].mxu1 %vm38_vm0, %v23_v4  ;;  %v26_v10 = vld [vmem:[%s470_s0 + $0x60] sm:$0xff]  ;;  %v20_v13 = vld [vmem:[%s470_s0 + $0x30] sm:$0xff]  ;;  %v21_v15 = vld [vmem:[%s470_s0 + $0x38] sm:$0xff] }
   0x6   :  { %292 = vmatprep.mubr.msk.f32.mxu0 %vm38_vm0, %v16_v5  ;;  %304 = vmatprep.mubr.msk.f32.mxu1 %vm38_vm0, %v24_v6  ;;  %v28_v14 = vld [vmem:[%s470_s0 + $0x70] sm:$0xff]  ;;  %v29_v16 = vld [vmem:[%s470_s0 + $0x78] sm:$0xff]  ;;  %v253_v17 = vld [vmem:[%s471_s2] ss:$0 sm:$0xff] }
   0x9   :  { %293 = vmatmul.mubr.msk.f32.gmra.mrb[2].mxu0 %vm38_vm0, %v17_v7  ;;  %305 = vmatmul.mubr.msk.f32.gmra.mrb[2].mxu1 %vm38_vm0, %v25_v8 }
   0xa   :  { %295 = vmatprep.mubr.msk.f32.mxu0 %vm38_vm0, %v18_v9  ;;  %307 = vmatprep.mubr.msk.f32.mxu1 %vm38_vm0, %v26_v10 }
   0xd   :  { %296 = vmatmul.mubr.msk.f32.gmra.mrb[4].mxu0 %vm38_vm0, %v19_v11  ;;  %308 = vmatmul.mubr.msk.f32.gmra.mrb[4].mxu1 %vm38_vm0, %v27_v12 }
   0xe   :  { %298 = vmatprep.mubr.msk.f32.mxu0 %vm38_vm0, %v20_v13  ;;  %310 = vmatprep.mubr.msk.f32.mxu1 %vm38_vm0, %v28_v14 }
  0x11   :  { %299 = vmatmul.mubr.msk.f32.gmra.mrb[6].mxu0 %vm38_vm0, %v21_v15  ;;  %311 = vmatmul.mubr.msk.f32.gmra.mrb[6].mxu1 %vm38_vm0, %v29_v16 }
  0xd8   :  { %v291_v18 = vpop.f32.mrb[0].mxu0  ;;  %v303_v19 = vpop.f32.mrb[0].mxu1 }
  0xd9   :  { %v159_v20 = vadd.f32 %v291_v18, %v253_v17  ;;  %v199_v21 = vadd.f32 %v303_v19, %v253_v17  ;;  %v153_v22 = vpop.f32.mrb[1].mxu0  ;;  %v193_v23 = vpop.f32.mrb[1].mxu1 }
  0xda   :  { %v154_v24 = vadd.f32 %v253_v17, %v153_v22  ;;  %v194_v25 = vadd.f32 %v253_v17, %v193_v23 }
  0xdb   :  { %234 = vst.msk [vmem:[%s472_s3 + $0x8] sm:$0xff] %vm232_vm1, %v159_v20  ;;  %242 = vst.msk [vmem:[%s472_s3 + $0x48] sm:$0xff] %vm232_vm1, %v199_v21 }
  0xdc   :  { %233 = vst.msk [vmem:[%s472_s3] sm:$0xff] %vm232_vm1, %v154_v24  ;;  %241 = vst.msk [vmem:[%s472_s3 + $0x40] sm:$0xff] %vm232_vm1, %v194_v25  ;;  %v294_v26 = vpop.f32.mrb[2].mxu0  ;;  %v306_v27 = vpop.f32.mrb[2].mxu1 }
  0xdd   :  { %v169_v28 = vadd.f32 %v294_v26, %v253_v17  ;;  %v209_v29 = vadd.f32 %v306_v27, %v253_v17  ;;  %v163_v30 = vpop.f32.mrb[3].mxu0  ;;  %v203_v31 = vpop.f32.mrb[3].mxu1 }
  0xde   :  { %v164_v32 = vadd.f32 %v253_v17, %v163_v30  ;;  %v204_v33 = vadd.f32 %v253_v17, %v203_v31 }
  0xdf   :  { %236 = vst.msk [vmem:[%s472_s3 + $0x18] sm:$0xff] %vm232_vm1, %v169_v28  ;;  %244 = vst.msk [vmem:[%s472_s3 + $0x58] sm:$0xff] %vm232_vm1, %v209_v29 }
  0xe0   :  { %235 = vst.msk [vmem:[%s472_s3 + $0x10] sm:$0xff] %vm232_vm1, %v164_v32  ;;  %243 = vst.msk [vmem:[%s472_s3 + $0x50] sm:$0xff] %vm232_vm1, %v204_v33  ;;  %v297_v34 = vpop.f32.mrb[4].mxu0  ;;  %v309_v35 = vpop.f32.mrb[4].mxu1 }
  0xe1   :  { %v179_v36 = vadd.f32 %v297_v34, %v253_v17  ;;  %v219_v37 = vadd.f32 %v309_v35, %v253_v17  ;;  %v173_v38 = vpop.f32.mrb[5].mxu0  ;;  %v213_v39 = vpop.f32.mrb[5].mxu1 }
  0xe2   :  { %v174_v40 = vadd.f32 %v253_v17, %v173_v38  ;;  %v214_v41 = vadd.f32 %v253_v17, %v213_v39 }
  0xe3   :  { %238 = vst.msk [vmem:[%s472_s3 + $0x28] sm:$0xff] %vm232_vm1, %v179_v36  ;;  %246 = vst.msk [vmem:[%s472_s3 + $0x68] sm:$0xff] %vm232_vm1, %v219_v37 }
  0xe4   :  { %237 = vst.msk [vmem:[%s472_s3 + $0x20] sm:$0xff] %vm232_vm1, %v174_v40  ;;  %245 = vst.msk [vmem:[%s472_s3 + $0x60] sm:$0xff] %vm232_vm1, %v214_v41  ;;  %v300_v42 = vpop.f32.mrb[6].mxu0  ;;  %v312_v43 = vpop.f32.mrb[6].mxu1 }
  0xe5   :  { %v189_v44 = vadd.f32 %v300_v42, %v253_v17  ;;  %v229_v45 = vadd.f32 %v312_v43, %v253_v17  ;;  %v183_v46 = vpop.f32.mrb[7].mxu0  ;;  %v223_v47 = vpop.f32.mrb[7].mxu1 }
  0xe6   :  { %v184_v48 = vadd.f32 %v253_v17, %v183_v46  ;;  %v224_v49 = vadd.f32 %v253_v17, %v223_v47 }
  0xe7   :  { %240 = vst.msk [vmem:[%s472_s3 + $0x38] sm:$0xff] %vm232_vm1, %v189_v44  ;;  %248 = vst.msk [vmem:[%s472_s3 + $0x78] sm:$0xff] %vm232_vm1, %v229_v45 }
  0xe8   :  { %239 = vst.msk [vmem:[%s472_s3 + $0x30] sm:$0xff] %vm232_vm1, %v184_v48  ;;  %247 = vst.msk [vmem:[%s472_s3 + $0x70] sm:$0xff] %vm232_vm1, %v224_v49 }

</bundles_post_ra>
